<compile_context>
chip_gen: v5e
topology: v5e:2x2
jax: 0.10.0
libtpu: 0.0.40
codegen_flags: <defaults>
</compile_context>

<pallas_src>
import jax
import jax.numpy as jnp
import numpy as np
from jax.experimental import pallas as pl
from jax.experimental.pallas import tpu as pltpu

_GROUP = 4  # samples packed per lane-dense row


def _round_up(x, m):
    return ((x + m - 1) // m) * m


def _vmem_limit_bytes():
    # Group-of-4 packing already cut the per-step VMEM footprint ~4x, so the
    # default scoped limit covers block_b up to ~16K samples.  Raise it a bit
    # for very large tiles, capped well below physical VMEM (64 MiB on v7x,
    # 128 MiB on v5e/v6e).
    try:
        cap = pltpu.get_tpu_info().vmem_capacity_bytes
    except Exception:
        cap = 128 << 20
    return int(min(64 << 20, (cap * 3) // 4))


def fusion_kernel(num_ref, size_ref, label_ref, sn_ref, ss_ref,
                  en_ref, es_ref, w1_ref, w2_ref, out_ref):
    f32 = jnp.float32

    def _packed_softmax(z, seg_ref):
        # Per-sample softmax on group-packed rows.  Subtracting the packed-row
        # max instead of the per-segment max is mathematically identical (a
        # per-row constant cancels inside every segment); it is only less
        # robust if the 4 samples sharing a row differ by >~80 in logits.
        # seg_ref is a constant 0/1 block-diagonal matrix that broadcasts the
        # per-segment sum back to every element in one tiny MXU matmul.
        m = jnp.max(z, axis=-1, keepdims=True)
        e = jnp.exp(z - m)
        seg_sum = jnp.dot(e, seg_ref[...], preferred_element_type=f32)
        # approx reciprocal (EUP slot): probabilities sum to 1 only to ~1e-3
        # relative accuracy -- fine for inference, flagged for awareness.
        return e * pl.reciprocal(seg_sum, approx=True)

    p_num = _packed_softmax(num_ref[...], sn_ref)     # (tb_r, G*C1)
    p_size = _packed_softmax(size_ref[...], ss_ref)   # (tb_r, G*C2)

    # p_exp[r, g*k + c*L + l] = p[sample g of row r, channel c], built with two
    # tiny constant 0/1 matmuls (no in-kernel reshape / concat / broadcast).
    p_exp = (jnp.dot(p_num, en_ref[...], preferred_element_type=f32) +
             jnp.dot(p_size, es_ref[...], preferred_element_type=f32))

    x = label_ref[...] * p_exp                                     # (tb_r, G*k)
    h = jnp.maximum(
        jnp.dot(x, w1_ref[...], preferred_element_type=f32), 0.0)  # (tb_r, G*OC)
    out = jnp.dot(h, w2_ref[...], preferred_element_type=f32)
    out_ref[...] = jnp.maximum(out, 0.0)       # dense 128-lane store (no mask)


def embedding_feature_fusion(num_polyps, polyp_sizes, label, w1, w2, *,
                             block_b=8192):
    """num_polyps (B,C1), polyp_sizes (B,C2), label (B,C,L),
       w1 (C,L,OC) [conv1 weight re-laid-out], w2 (OC,OC) [conv2] -> (B,OC).

       block_b = samples per grid step.  8192 amortizes the ~0.35us per-step
       overhead on v6e; on v7x pick block_b so the grid length is >= 2 (ideally
       even) at your production batch size or one TensorCore sits idle."""
    B, c1 = num_polyps.shape
    c2 = polyp_sizes.shape[1]
    _, c, l = label.shape
    oc = w2.shape[1]
    k = c * l
    G = _GROUP
    assert c == c1 + c2, "label channels must equal C1 + C2"

    # --- sample-axis padding so packed rows tile cleanly --------------------
    row_align = 8 * G                       # 8 sublanes worth of packed rows
    tb_s = min(block_b, _round_up(B, row_align))
    tb_s = _round_up(tb_s, row_align)       # rows per step divisible by 8
    bs = _round_up(B, tb_s)                 # padded sample count, grid divides
    br, tb_r = bs // G, tb_s // G
    grid = (bs // tb_s,)

    pad = bs - B
    num_p = jnp.pad(num_polyps.astype(jnp.float32), ((0, pad), (0, 0)))
    size_p = jnp.pad(polyp_sizes.astype(jnp.float32), ((0, pad), (0, 0)))
    label_p = jnp.pad(label.astype(jnp.float32), ((0, pad), (0, 0), (0, 0)))
    # NOTE: padded tail rows are zeros -> softmax gives 1/C per element, the
    # corresponding outputs are computed but sliced off below; harmless.

    # Group-of-4 lane packing: free, row-major reshapes of contiguous data.
    num_g = num_p.reshape(br, G * c1)       # (Br, 8)
    size_g = size_p.reshape(br, G * c2)     # (Br, 12)
    label_g = label_p.reshape(br, G * k)    # (Br, 80)  lane-dense-ish rows

    # Constant matrices (static; resident in VMEM across all grid steps).
    # Segment-sum broadcast matrices for the grouped softmax:
    seg_num = np.kron(np.eye(G, dtype=np.float32),
                      np.ones((c1, c1), np.float32))          # (G*C1, G*C1)
    seg_size = np.kron(np.eye(G, dtype=np.float32),
                       np.ones((c2, c2), np.float32))         # (G*C2, G*C2)
    # Probability -> per-position expansion (repeat each channel prob L times):
    e_full = np.kron(np.eye(c, dtype=np.float32),
                     np.ones((1, l), np.float32))              # (C, k)
    e_num = np.kron(np.eye(G, dtype=np.float32), e_full[:c1])  # (G*C1, G*k)
    e_size = np.kron(np.eye(G, dtype=np.float32), e_full[c1:])  # (G*C2, G*k)

    # Block-diagonal weights so packed rows stay independent per sample.
    eye_g = jnp.eye(G, dtype=jnp.float32)
    w1_bd = jnp.kron(eye_g, w1.reshape(k, oc).astype(jnp.float32))  # (G*k, G*OC)
    w2_bd = jnp.kron(eye_g, w2.astype(jnp.float32))                 # (G*OC, G*OC)

    row_map = lambda i: (i, 0)
    const_map = lambda i: (0, 0)

    out = pl.pallas_call(
        fusion_kernel,
        out_shape=jax.ShapeDtypeStruct((br, G * oc), jnp.float32),
        grid_spec=pltpu.PrefetchScalarGridSpec(
            num_scalar_prefetch=0,
            grid=grid,
            in_specs=[
                pl.BlockSpec((tb_r, G * c1), row_map),      # streamed over B
                pl.BlockSpec((tb_r, G * c2), row_map),      # streamed over B
                pl.BlockSpec((tb_r, G * k), row_map),       # streamed over B
                pl.BlockSpec((G * c1, G * c1), const_map),  # resident in VMEM
                pl.BlockSpec((G * c2, G * c2), const_map),  # resident in VMEM
                pl.BlockSpec((G * c1, G * k), const_map),   # resident in VMEM
                pl.BlockSpec((G * c2, G * k), const_map),   # resident in VMEM
                pl.BlockSpec((G * k, G * oc), const_map),   # resident in VMEM
                pl.BlockSpec((G * oc, G * oc), const_map),  # resident in VMEM
            ],
            out_specs=pl.BlockSpec((tb_r, G * oc), row_map),  # 128-lane dense
        ),
        compiler_params=pltpu.CompilerParams(
            dimension_semantics=("parallel",),
            vmem_limit_bytes=_vmem_limit_bytes()),
    )(num_g, size_g, label_g,
      jnp.asarray(seg_num), jnp.asarray(seg_size),
      jnp.asarray(e_num), jnp.asarray(e_size), w1_bd, w2_bd)

    return out.reshape(bs, oc)[:B]


def reference(num_polyps, polyp_sizes, label, w1, w2):
    """Pure-JAX mirror of the PyTorch forward pass."""
    p_num = jax.nn.softmax(num_polyps, axis=1)
    p_size = jax.nn.softmax(polyp_sizes, axis=1)
    prob = jnp.concatenate([p_num, p_size], axis=1)[:, :, None]    # (B, C, 1)
    x = (label * prob).reshape(label.shape[0], -1)                 # (B, C*L)
    h = jnp.maximum(x @ w1.reshape(-1, w1.shape[-1]), 0.0)
    return jnp.maximum(h @ w2, 0.0)


if __name__ == "__main__":
    # in_c = (C1, C2, L), out_c = OC.
    C1, C2, L, OC = 2, 3, 4, 32
    C = C1 + C2

    fused = jax.jit(embedding_feature_fusion, static_argnames=("block_b",))

    def run_case(B, block_b):
        keys = jax.random.split(jax.random.fold_in(jax.random.PRNGKey(0), B), 5)
        num_polyps = jax.random.normal(keys[0], (B, C1), dtype=jnp.float32)
        polyp_sizes = jax.random.normal(keys[1], (B, C2), dtype=jnp.float32)
        label = jax.random.normal(keys[2], (B, C, L), dtype=jnp.float32)
        # Synthetic params (equivalent up to reshape/transpose to the two
        # bias-free 1x1 Conv2d weights of the PyTorch module).
        w1 = 0.1 * jax.random.normal(keys[3], (C, L, OC), dtype=jnp.float32)
        w2 = 0.1 * jax.random.normal(keys[4], (OC, OC), dtype=jnp.float32)

        out = jax.block_until_ready(
            fused(num_polyps, polyp_sizes, label, w1, w2, block_b=block_b))
        ref = reference(num_polyps, polyp_sizes, label, w1, w2)
        assert out.shape == (B, OC)
        assert jnp.allclose(out, ref, atol=2e-3, rtol=2e-3), \
            f"mismatch vs JAX reference at B={B}"

    run_case(2, 8192)      # tiny demo shape; exercises the sample-padding path
    run_case(2500, 1024)   # ragged B, 3-step grid, resident constants reused
    print("KERNEL_OK")
</pallas_src>

<mosaic_0001>
module attributes {stable_mosaic.version = 11 : i64} {
  func.func @fusion_kernel(%arg0: i32, %arg1: memref<8x8xf32, #tpu.memory_space<vmem>>, %arg2: memref<8x12xf32, #tpu.memory_space<vmem>>, %arg3: memref<8x80xf32, #tpu.memory_space<vmem>>, %arg4: memref<8x8xf32, #tpu.memory_space<vmem>>, %arg5: memref<12x12xf32, #tpu.memory_space<vmem>>, %arg6: memref<8x80xf32, #tpu.memory_space<vmem>>, %arg7: memref<12x80xf32, #tpu.memory_space<vmem>>, %arg8: memref<80x128xf32, #tpu.memory_space<vmem>>, %arg9: memref<128x128xf32, #tpu.memory_space<vmem>>, %arg10: memref<8x128xf32, #tpu.memory_space<vmem>>) attributes {dimension_semantics = [#tpu.dimension_semantics<parallel>], iteration_bounds = array<i64: 1>, scalar_prefetch = 0 : i64, scratch_operands = 0 : i64, tpu.core_type = #tpu.core_type<tc>, window_params = [{transform_indices = @transform_0, window_bounds = array<i64: 8, 8>}, {transform_indices = @transform_1, window_bounds = array<i64: 8, 12>}, {transform_indices = @transform_2, window_bounds = array<i64: 8, 80>}, {pipeline_mode = #tpu.pipeline_mode<synchronous>, transform_indices = @transform_3, window_bounds = array<i64: 8, 8>}, {pipeline_mode = #tpu.pipeline_mode<synchronous>, transform_indices = @transform_4, window_bounds = array<i64: 12, 12>}, {pipeline_mode = #tpu.pipeline_mode<synchronous>, transform_indices = @transform_5, window_bounds = array<i64: 8, 80>}, {pipeline_mode = #tpu.pipeline_mode<synchronous>, transform_indices = @transform_6, window_bounds = array<i64: 12, 80>}, {pipeline_mode = #tpu.pipeline_mode<synchronous>, transform_indices = @transform_7, window_bounds = array<i64: 80, 128>}, {pipeline_mode = #tpu.pipeline_mode<synchronous>, transform_indices = @transform_8, window_bounds = array<i64: 128, 128>}, {transform_indices = @transform_9, window_bounds = array<i64: 8, 128>}]} {
    %c0 = arith.constant 0 : index
    %c0_0 = arith.constant 0 : index
    %0 = vector.load %arg1[%c0, %c0_0] : memref<8x8xf32, #tpu.memory_space<vmem>>, vector<8x8xf32>
    %cst = arith.constant dense<0xFF800000> : vector<8xf32>
    %1 = vector.multi_reduction <maximumf>, %0, %cst [1] : vector<8x8xf32> to vector<8xf32>
    %2 = vector.shape_cast %1 : vector<8xf32> to vector<8x1xf32>
    %3 = vector.broadcast %2 : vector<8x1xf32> to vector<8x8xf32>
    %4 = arith.subf %0, %3 : vector<8x8xf32>
    %5 = math.exp %4 : vector<8x8xf32>
    %c0_1 = arith.constant 0 : index
    %c0_2 = arith.constant 0 : index
    %6 = vector.load %arg4[%c0_1, %c0_2] : memref<8x8xf32, #tpu.memory_space<vmem>>, vector<8x8xf32>
    %cst_3 = arith.constant dense<0.000000e+00> : vector<8x8xf32>
    %7 = tpu.matmul %5, %6, %cst_3 {dimension_numbers = #tpu.dot_dimension_numbers<[1], [0], [0], [1], [0, 0, 1, 1], [], []>} : vector<8x8xf32>, vector<8x8xf32>, vector<8x8xf32> -> vector<8x8xf32>
    %8 = tpu.reciprocal %7 {approx = true} : vector<8x8xf32> -> vector<8x8xf32>
    %9 = arith.mulf %5, %8 : vector<8x8xf32>
    %c0_4 = arith.constant 0 : index
    %c0_5 = arith.constant 0 : index
    %10 = vector.load %arg2[%c0_4, %c0_5] : memref<8x12xf32, #tpu.memory_space<vmem>>, vector<8x12xf32>
    %cst_6 = arith.constant dense<0xFF800000> : vector<8xf32>
    %11 = vector.multi_reduction <maximumf>, %10, %cst_6 [1] : vector<8x12xf32> to vector<8xf32>
    %12 = vector.shape_cast %11 : vector<8xf32> to vector<8x1xf32>
    %13 = vector.broadcast %12 : vector<8x1xf32> to vector<8x12xf32>
    %14 = arith.subf %10, %13 : vector<8x12xf32>
    %15 = math.exp %14 : vector<8x12xf32>
    %c0_7 = arith.constant 0 : index
    %c0_8 = arith.constant 0 : index
    %16 = vector.load %arg5[%c0_7, %c0_8] : memref<12x12xf32, #tpu.memory_space<vmem>>, vector<12x12xf32>
    %cst_9 = arith.constant dense<0.000000e+00> : vector<8x12xf32>
    %17 = tpu.matmul %15, %16, %cst_9 {dimension_numbers = #tpu.dot_dimension_numbers<[1], [0], [0], [1], [0, 0, 1, 1], [], []>} : vector<8x12xf32>, vector<12x12xf32>, vector<8x12xf32> -> vector<8x12xf32>
    %18 = tpu.reciprocal %17 {approx = true} : vector<8x12xf32> -> vector<8x12xf32>
    %19 = arith.mulf %15, %18 : vector<8x12xf32>
    %c0_10 = arith.constant 0 : index
    %c0_11 = arith.constant 0 : index
    %20 = vector.load %arg6[%c0_10, %c0_11] : memref<8x80xf32, #tpu.memory_space<vmem>>, vector<8x80xf32>
    %cst_12 = arith.constant dense<0.000000e+00> : vector<8x80xf32>
    %21 = tpu.matmul %9, %20, %cst_12 {dimension_numbers = #tpu.dot_dimension_numbers<[1], [0], [0], [1], [0, 0, 1, 1], [], []>} : vector<8x8xf32>, vector<8x80xf32>, vector<8x80xf32> -> vector<8x80xf32>
    %c0_13 = arith.constant 0 : index
    %c0_14 = arith.constant 0 : index
    %22 = vector.load %arg7[%c0_13, %c0_14] : memref<12x80xf32, #tpu.memory_space<vmem>>, vector<12x80xf32>
    %cst_15 = arith.constant dense<0.000000e+00> : vector<8x80xf32>
    %23 = tpu.matmul %19, %22, %cst_15 {dimension_numbers = #tpu.dot_dimension_numbers<[1], [0], [0], [1], [0, 0, 1, 1], [], []>} : vector<8x12xf32>, vector<12x80xf32>, vector<8x80xf32> -> vector<8x80xf32>
    %24 = arith.addf %21, %23 : vector<8x80xf32>
    %c0_16 = arith.constant 0 : index
    %c0_17 = arith.constant 0 : index
    %25 = vector.load %arg3[%c0_16, %c0_17] : memref<8x80xf32, #tpu.memory_space<vmem>>, vector<8x80xf32>
    %26 = arith.mulf %25, %24 : vector<8x80xf32>
    %c0_18 = arith.constant 0 : index
    %c0_19 = arith.constant 0 : index
    %27 = vector.load %arg8[%c0_18, %c0_19] : memref<80x128xf32, #tpu.memory_space<vmem>>, vector<80x128xf32>
    %cst_20 = arith.constant dense<0.000000e+00> : vector<8x128xf32>
    %28 = tpu.matmul %26, %27, %cst_20 {dimension_numbers = #tpu.dot_dimension_numbers<[1], [0], [0], [1], [0, 0, 1, 1], [], []>} : vector<8x80xf32>, vector<80x128xf32>, vector<8x128xf32> -> vector<8x128xf32>
    %cst_21 = arith.constant 0.000000e+00 : f32
    %29 = vector.broadcast %cst_21 : f32 to vector<8x128xf32>
    %30 = arith.maximumf %28, %29 : vector<8x128xf32>
    %c0_22 = arith.constant 0 : index
    %c0_23 = arith.constant 0 : index
    %31 = vector.load %arg9[%c0_22, %c0_23] : memref<128x128xf32, #tpu.memory_space<vmem>>, vector<128x128xf32>
    %cst_24 = arith.constant dense<0.000000e+00> : vector<8x128xf32>
    %32 = tpu.matmul %30, %31, %cst_24 {dimension_numbers = #tpu.dot_dimension_numbers<[1], [0], [0], [1], [0, 0, 1, 1], [], []>} : vector<8x128xf32>, vector<128x128xf32>, vector<8x128xf32> -> vector<8x128xf32>
    %cst_25 = arith.constant 0.000000e+00 : f32
    %33 = vector.broadcast %cst_25 : f32 to vector<8x128xf32>
    %34 = arith.maximumf %32, %33 : vector<8x128xf32>
    %c0_26 = arith.constant 0 : index
    %c0_27 = arith.constant 0 : index
    %35 = vector.load %arg10[%c0_26, %c0_27] : memref<8x128xf32, #tpu.memory_space<vmem>>, vector<8x128xf32>
    tpu.vector_store %arg10[%c0_26, %c0_27], %34 {strides = array<i32>} : memref<8x128xf32, #tpu.memory_space<vmem>>, vector<8x128xf32>,
    return
  }
  func.func @transform_0(%arg0: i32) -> (i32, i32) {
    %c0_i32 = arith.constant 0 : i32
    %c0_i32_0 = arith.constant 0 : i32
    return %arg0, %c0_i32 : i32, i32
  }
  func.func @transform_1(%arg0: i32) -> (i32, i32) {
    %c0_i32 = arith.constant 0 : i32
    %c0_i32_0 = arith.constant 0 : i32
    return %arg0, %c0_i32 : i32, i32
  }
  func.func @transform_2(%arg0: i32) -> (i32, i32) {
    %c0_i32 = arith.constant 0 : i32
    %c0_i32_0 = arith.constant 0 : i32
    return %arg0, %c0_i32 : i32, i32
  }
  func.func @transform_3(%arg0: i32) -> (i32, i32) {
    %c0_i32 = arith.constant 0 : i32
    %c0_i32_0 = arith.constant 0 : i32
    %c0_i32_1 = arith.constant 0 : i32
    return %c0_i32, %c0_i32_0 : i32, i32
  }
  func.func @transform_4(%arg0: i32) -> (i32, i32) {
    %c0_i32 = arith.constant 0 : i32
    %c0_i32_0 = arith.constant 0 : i32
    %c0_i32_1 = arith.constant 0 : i32
    return %c0_i32, %c0_i32_0 : i32, i32
  }
  func.func @transform_5(%arg0: i32) -> (i32, i32) {
    %c0_i32 = arith.constant 0 : i32
    %c0_i32_0 = arith.constant 0 : i32
    %c0_i32_1 = arith.constant 0 : i32
    return %c0_i32, %c0_i32_0 : i32, i32
  }
  func.func @transform_6(%arg0: i32) -> (i32, i32) {
    %c0_i32 = arith.constant 0 : i32
    %c0_i32_0 = arith.constant 0 : i32
    %c0_i32_1 = arith.constant 0 : i32
    return %c0_i32, %c0_i32_0 : i32, i32
  }
  func.func @transform_7(%arg0: i32) -> (i32, i32) {
    %c0_i32 = arith.constant 0 : i32
    %c0_i32_0 = arith.constant 0 : i32
    %c0_i32_1 = arith.constant 0 : i32
    return %c0_i32, %c0_i32_0 : i32, i32
  }
  func.func @transform_8(%arg0: i32) -> (i32, i32) {
    %c0_i32 = arith.constant 0 : i32
    %c0_i32_0 = arith.constant 0 : i32
    %c0_i32_1 = arith.constant 0 : i32
    return %c0_i32, %c0_i32_0 : i32, i32
  }
  func.func @transform_9(%arg0: i32) -> (i32, i32) {
    %c0_i32 = arith.constant 0 : i32
    %c0_i32_0 = arith.constant 0 : i32
    return %arg0, %c0_i32 : i32, i32
  }
}

</mosaic_0001>

<bundles_post_ra>
// kernel: mul.4
= control target key start
LH: loop header
LB: loop body
LE: loop exit
PB: predicated region body
PF: predicated region fallthrough
CT: control target
= control target key end

     0   :  { %vm23_vm0 = vcmask 261120   ;;  %s93_s0 = inlined_call_operand.vmem [shape: f32[5,4,32], index: 0, kind: input, shape index: {}]   ;;  %s94_s1 = inlined_call_operand.vmem [shape: f32[20,32], index: 1, kind: output, shape index: {}]  }
   0x1   :  { %v45_v0 = vld [vmem:[%s93_s0 + $0x10] sm:$0xf]  ;;  %v46_v1 = vld [vmem:[%s93_s0 + $0xc] sm:$0xf]  ;;  %v47_v2 = vld [vmem:[%s93_s0 + $0x8] sm:$0xf] }
   0x2   :  { %7 = vst [vmem:[#allocation0 + $0x18] sm:$0xf] %v45_v0  ;;  %v48_v3 = vld [vmem:[%s93_s0 + $0x4] sm:$0xf]  ;;  %v20_v4 = vld [vmem:[%s93_s0] sm:$0xf] }
   0x3   :  { %11 = vst [vmem:[#allocation0 + $0x20] sm:$0xf] %v46_v1 }
   0x4   :  { %15 = vst [vmem:[#allocation0] sm:$0xf] %v47_v2 }
   0x5   :  { %19 = vst [vmem:[#allocation0 + $0x10] sm:$0xf] %v48_v3 }
   0x6   :  { %21 = vst [vmem:[#allocation0 + $0x8] sm:$0xf] %v20_v4 }
   0x9   :  { %v41_v5 = vld [vmem:[#allocation0 + $0x18] sm:$0xf]  }
   0xa   :  { %v36_v6 = vld [vmem:[#allocation0 + $0x20] sm:$0xf]   ;;  %52 = vst.msk [vmem:[%s94_s1 + $0x10] sm:$0xf] %vm23_vm0, %v41_v5  }
   0xb   :  { %v31_v7 = vld [vmem:[#allocation0] sm:$0xf]   ;;  %51 = vst.msk [vmem:[%s94_s1 + $0xc] sm:$0xf] %vm23_vm0, %v36_v6  }
   0xc   :  { %v26_v8 = vld [vmem:[#allocation0 + $0x10] sm:$0xf]   ;;  %50 = vst.msk [vmem:[%s94_s1 + $0x8] sm:$0xf] %vm23_vm0, %v31_v7  }
   0xd   :  { %v22_v9 = vld [vmem:[#allocation0 + $0x8] sm:$0xf]   ;;  %49 = vst.msk [vmem:[%s94_s1 + $0x4] sm:$0xf] %vm23_vm0, %v26_v8  }
   0xe   :  { %24 = vst.msk [vmem:[%s94_s1] sm:$0xf] %vm23_vm0, %v22_v9  }

</bundles_post_ra>
